<compile_context>
chip_gen: v5e
topology: v5e:2x2
jax: 0.10.0
libtpu: 0.0.40
codegen_flags: <defaults>
</compile_context>

<pallas_src>
import functools

import jax
import jax.numpy as jnp
from jax import lax
from jax.experimental import pallas as pl
from jax.experimental.pallas import tpu as pltpu

EPS = 1e-10


def _compute_probs_kernel(code_c_ref, code_bg_ref, protos_ref, out_ref):
    # code_c_ref / code_bg_ref: (Bt, C, P) in caller dtype (f32 or bf16)
    # protos_ref:               (V, C) f32, already L2-normalized (hoisted)
    # out_ref:                  (Bt, V+1, P) f32
    pn = protos_ref[...]                                  # (V, C)
    Bt = code_c_ref.shape[0]
    P = code_c_ref.shape[2]

    # hoisted: iota built once per grid step (JAX does not CSE broadcasts)
    lane_iota = lax.broadcasted_iota(jnp.int32, (1, P), 1)

    # Batch rows are folded into this grid step and unrolled in-register.
    for b in range(Bt):
        xc = code_c_ref[b].astype(jnp.float32)            # (C, P)
        xbg = code_bg_ref[b].astype(jnp.float32)          # (C, P)

        # F.normalize(dim=1, eps=1e-10): x / max(||x||, eps)
        #   == x * rsqrt(max(||x||^2, eps^2))  (EUP rsqrt, no divide)
        cn = xc * lax.rsqrt(
            jnp.maximum(jnp.sum(xc * xc, axis=0, keepdims=True), EPS * EPS))
        bgn = xbg * lax.rsqrt(
            jnp.maximum(jnp.sum(xbg * xbg, axis=0, keepdims=True), EPS * EPS))

        # prob_C: einsum('bchw,vc->bvhw') == (V, C) @ (C, P); contraction dims
        # already adjacent -> MXU matmul, no transpose of either tile.
        prob_c = jnp.dot(pn, cn, precision=lax.Precision.HIGHEST,
                         preferred_element_type=jnp.float32)           # (V, P)

        # per-pixel class sum; first-occurrence argmin over pixels (lane axis)
        all_prob = jnp.sum(prob_c, axis=0, keepdims=True)              # (1, P)
        min_val = jnp.min(all_prob, axis=1, keepdims=True)             # (1, 1)
        min_idx = jnp.min(jnp.where(all_prob == min_val, lane_iota, P),
                          axis=1, keepdims=True)                       # (1, 1)

        # normalized BG vector at the min pixel (masked lane reduction, O(C*P);
        # see TODO at top about dynamic lane gather for large P)
        mask = lane_iota == min_idx                                    # (1, P)
        min_vec = jnp.sum(jnp.where(mask, bgn, 0.0), axis=1,
                          keepdims=True)                               # (C, 1)

        # prob_BG: einsum('bchw,bc->bhw') -> (1, P)
        prob_bg = jnp.sum(bgn * min_vec, axis=0, keepdims=True)        # (1, P)

        # softmax over classes.  Logits are cosine similarities in [-1, 1], so
        # the max-shift is unnecessary (exp cannot overflow).
        e = jnp.exp(jnp.concatenate([prob_bg, prob_c], axis=0))        # (V+1, P)
        inv = pl.reciprocal(jnp.sum(e, axis=0, keepdims=True),
                            approx=False)                              # (1, P)
        out_ref[b] = e * inv                             # single lane-dense store


def generate_prototypes_mean(ref_code_c, patch_coord, cls_mask, n_classes):
    """Glue: mean-mode prototype generation (gather at coords + per-class mean)."""
    num_vectors, C = ref_code_c.shape[0], ref_code_c.shape[1]
    # torch: ref_code_c[i, :, coord[i,1], coord[i,0]]
    code_vectors = ref_code_c[jnp.arange(num_vectors), :,
                              patch_coord[:, 1], patch_coord[:, 0]]     # (N, C)
    protos = jnp.zeros((n_classes, C), jnp.float32).at[cls_mask].add(code_vectors)
    repeat = jnp.zeros((n_classes,), jnp.float32).at[cls_mask].add(1.0)
    protos = jnp.where(repeat[:, None] > 0,
                       protos / jnp.maximum(repeat[:, None], 1.0),
                       protos)
    return protos


@functools.partial(jax.jit, static_argnames=("n_classes_m1",))
def compute_probs_forward(code_C, code_BG, ref_code_c, patch_coord, cls_mask,
                          n_classes_m1):
    # Inputs in NCHW (same as PyTorch), any float dtype (f32 / bf16).
    # Channels-first kernel layout means (B, C, H*W) is a FREE reshape.
    B, C, H, W = code_C.shape
    V = n_classes_m1
    P = H * W

    protos = generate_prototypes_mean(ref_code_c, patch_coord, cls_mask, V)  # (V, C)
    # Hoisted: L2-normalize the prototypes ONCE in XLA (was per grid step).
    pn = protos * lax.rsqrt(
        jnp.maximum(jnp.sum(protos * protos, axis=1, keepdims=True), EPS * EPS))

    cC = code_C.reshape(B, C, P)      # keep caller dtype; kernel upcasts in-register
    cBG = code_BG.reshape(B, C, P)

    # Batch folding: at most 2 fat grid steps.  Fewer/fatter steps amortize the
    # fixed per-step overhead on v5e/v6e, while a >=2-wide "parallel" axis keeps
    # both v7x TensorCores busy when B >= 2.
    steps = 2 if B >= 2 else 1
    Bt = pl.cdiv(B, steps)
    steps = pl.cdiv(B, Bt)

    out = pl.pallas_call(
        _compute_probs_kernel,
        out_shape=jax.ShapeDtypeStruct((B, V + 1, P), jnp.float32),
        grid=(steps,),
        in_specs=[
            pl.BlockSpec((Bt, C, P), lambda i: (i, 0, 0)),
            pl.BlockSpec((Bt, C, P), lambda i: (i, 0, 0)),
            # constant block index -> prototypes fetched once, not per step
            pl.BlockSpec((V, C), lambda i: (0, 0)),
        ],
        out_specs=pl.BlockSpec((Bt, V + 1, P), lambda i: (i, 0, 0)),
        compiler_params=pltpu.CompilerParams(dimension_semantics=("parallel",)),
    )(cC, cBG, pn)

    # back to NCHW: (B, V+1, H, W) -- free reshape, no transpose.
    return out.reshape(B, V + 1, H, W)


def _reference_forward(code_C, code_BG, protos):
    """Pure-JAX NCHW reference mirroring the PyTorch forward (mean mode)."""
    def normc(t):
        n = jnp.sqrt(jnp.sum(t * t, axis=1, keepdims=True))
        return t / jnp.maximum(n, EPS)

    code_C = normc(code_C.astype(jnp.float32))
    code_BG = normc(code_BG.astype(jnp.float32))
    pnorm = protos / jnp.maximum(
        jnp.sqrt(jnp.sum(protos * protos, axis=1, keepdims=True)), EPS)
    prob_C = jnp.einsum('bchw,vc->bvhw', code_C, pnorm, precision='highest')
    all_prob = jnp.sum(prob_C, axis=1)                       # (B, H, W)
    flat = all_prob.reshape(all_prob.shape[0], -1)
    idx = jnp.argmin(flat, axis=1)
    Wd = all_prob.shape[2]
    ix, iy = idx // Wd, idx % Wd
    min_vec = code_BG[jnp.arange(code_BG.shape[0]), :, ix, iy]   # (B, C)
    prob_BG = jnp.einsum('bchw,bc->bhw', code_BG, min_vec,
                         precision='highest')[:, None]
    probs = jnp.concatenate([prob_BG, prob_C], axis=1)
    return jax.nn.softmax(probs, axis=1)


if __name__ == "__main__":
    key = jax.random.PRNGKey(0)
    k1, k2, k3, k4 = jax.random.split(key, 4)

    # Small shapes consistent with the module: dim(C)=32, H=W=16, n_classes=5
    # -> V = 4 foreground classes, 8 ref vectors.  B=4 exercises the batch-folded
    # path (2 batches per grid step, 2 grid steps).
    B, C, H, W = 4, 32, 16, 16
    n_classes = 5
    V = n_classes - 1
    num_vectors = 8
    Hr, Wr = 16, 16

    code_C = jax.random.normal(k1, (B, C, H, W), dtype=jnp.float32)
    code_BG = jax.random.normal(k2, (B, C, H, W), dtype=jnp.float32)
    ref_code_c = jax.random.normal(k3, (num_vectors, C, Hr, Wr), dtype=jnp.float32)
    # synthetic "point data": (x, y) patch coords and class mask covering all classes
    patch_coord = jax.random.randint(k4, (num_vectors, 2), 0,
                                     min(Hr, Wr)).astype(jnp.int32)
    cls_mask = jnp.array([0, 1, 2, 3, 0, 1, 2, 3], dtype=jnp.int32)

    # --- fp32 path (matches the PyTorch module) ---
    out = compute_probs_forward(code_C, code_BG, ref_code_c, patch_coord,
                                cls_mask, V)
    out = jax.block_until_ready(out)

    protos = generate_prototypes_mean(ref_code_c, patch_coord, cls_mask, V)
    ref = _reference_forward(code_C, code_BG, protos)
    assert out.shape == (B, n_classes, H, W), out.shape
    err = float(jnp.max(jnp.abs(out - ref)))
    assert jnp.allclose(out, ref, atol=1e-4, rtol=1e-4), err

    # --- bf16 activation path (no wrapper upcast; kernel casts in-register) ---
    out_bf = compute_probs_forward(code_C.astype(jnp.bfloat16),
                                   code_BG.astype(jnp.bfloat16),
                                   ref_code_c, patch_coord, cls_mask, V)
    out_bf = jax.block_until_ready(out_bf)
    ref_bf = _reference_forward(code_C.astype(jnp.bfloat16),
                                code_BG.astype(jnp.bfloat16), protos)
    err_bf = float(jnp.max(jnp.abs(out_bf - ref_bf)))
    assert jnp.allclose(out_bf, ref_bf, atol=1e-3, rtol=1e-3), err_bf

    print("KERNEL_OK")
</pallas_src>

<mosaic_0001>
module attributes {stable_mosaic.version = 11 : i64} {
  func.func @_compute_probs_kernel(%arg0: i32, %arg1: memref<2x32x256xf32, #tpu.memory_space<vmem>>, %arg2: memref<2x32x256xf32, #tpu.memory_space<vmem>>, %arg3: memref<4x32xf32, #tpu.memory_space<vmem>>, %arg4: memref<2x5x256xf32, #tpu.memory_space<vmem>>) attributes {dimension_semantics = [#tpu.dimension_semantics<parallel>], iteration_bounds = array<i64: 2>, scalar_prefetch = 0 : i64, scratch_operands = 0 : i64, tpu.core_type = #tpu.core_type<tc>, window_params = [{transform_indices = @transform_0, window_bounds = array<i64: 2, 32, 256>}, {transform_indices = @transform_1, window_bounds = array<i64: 2, 32, 256>}, {pipeline_mode = #tpu.pipeline_mode<synchronous>, transform_indices = @transform_2, window_bounds = array<i64: 4, 32>}, {transform_indices = @transform_3, window_bounds = array<i64: 2, 5, 256>}]} {
    %c0 = arith.constant 0 : index
    %c0_0 = arith.constant 0 : index
    %0 = vector.load %arg3[%c0, %c0_0] : memref<4x32xf32, #tpu.memory_space<vmem>>, vector<4x32xf32>
    %1 = tpu.iota {dimensions = array<i32: 1>} : vector<1x256xi32>
    %c0_1 = arith.constant 0 : index
    %c0_2 = arith.constant 0 : index
    %c0_3 = arith.constant 0 : index
    %2 = vector.load %arg1[%c0_1, %c0_2, %c0_3] : memref<2x32x256xf32, #tpu.memory_space<vmem>>, vector<1x32x256xf32>
    %3 = vector.shape_cast %2 : vector<1x32x256xf32> to vector<32x256xf32>
    %c0_4 = arith.constant 0 : index
    %c0_5 = arith.constant 0 : index
    %c0_6 = arith.constant 0 : index
    %4 = vector.load %arg2[%c0_4, %c0_5, %c0_6] : memref<2x32x256xf32, #tpu.memory_space<vmem>>, vector<1x32x256xf32>
    %5 = vector.shape_cast %4 : vector<1x32x256xf32> to vector<32x256xf32>
    %6 = arith.mulf %3, %3 : vector<32x256xf32>
    %cst = arith.constant dense<0.000000e+00> : vector<256xf32>
    %7 = vector.multi_reduction <add>, %6, %cst [0] : vector<32x256xf32> to vector<256xf32>
    %8 = vector.shape_cast %7 : vector<256xf32> to vector<1x256xf32>
    %cst_7 = arith.constant 9.99999968E-21 : f32
    %9 = vector.broadcast %cst_7 : f32 to vector<1x256xf32>
    %10 = arith.maximumf %8, %9 : vector<1x256xf32>
    %11 = math.rsqrt %10 : vector<1x256xf32>
    %12 = vector.broadcast %11 : vector<1x256xf32> to vector<32x256xf32>
    %13 = arith.mulf %3, %12 : vector<32x256xf32>
    %14 = arith.mulf %5, %5 : vector<32x256xf32>
    %cst_8 = arith.constant dense<0.000000e+00> : vector<256xf32>
    %15 = vector.multi_reduction <add>, %14, %cst_8 [0] : vector<32x256xf32> to vector<256xf32>
    %16 = vector.shape_cast %15 : vector<256xf32> to vector<1x256xf32>
    %cst_9 = arith.constant 9.99999968E-21 : f32
    %17 = vector.broadcast %cst_9 : f32 to vector<1x256xf32>
    %18 = arith.maximumf %16, %17 : vector<1x256xf32>
    %19 = math.rsqrt %18 : vector<1x256xf32>
    %20 = vector.broadcast %19 : vector<1x256xf32> to vector<32x256xf32>
    %21 = arith.mulf %5, %20 : vector<32x256xf32>
    %cst_10 = arith.constant dense<0.000000e+00> : vector<4x256xf32>
    %22 = tpu.matmul %0, %13, %cst_10 {dimension_numbers = #tpu.dot_dimension_numbers<[1], [0], [0], [1], [0, 0, 1, 1], [], []>, precision = #tpu.contract_precision<fp32>} : vector<4x32xf32>, vector<32x256xf32>, vector<4x256xf32> -> vector<4x256xf32>
    %cst_11 = arith.constant dense<0.000000e+00> : vector<256xf32>
    %23 = vector.multi_reduction <add>, %22, %cst_11 [0] : vector<4x256xf32> to vector<256xf32>
    %24 = vector.shape_cast %23 : vector<256xf32> to vector<1x256xf32>
    %cst_12 = arith.constant dense<0x7F800000> : vector<1xf32>
    %25 = vector.multi_reduction <minimumf>, %24, %cst_12 [1] : vector<1x256xf32> to vector<1xf32>
    %26 = vector.shape_cast %25 : vector<1xf32> to vector<1x1xf32>
    %27 = vector.broadcast %26 : vector<1x1xf32> to vector<1x256xf32>
    %28 = arith.cmpf oeq, %24, %27 : vector<1x256xf32>
    %c256_i32 = arith.constant 256 : i32
    %29 = vector.broadcast %c256_i32 : i32 to vector<1x256xi32>
    %30 = arith.select %28, %1, %29 : vector<1x256xi1>, vector<1x256xi32>
    %cst_13 = arith.constant dense<2147483647> : vector<1xi32>
    %31 = vector.multi_reduction <minsi>, %30, %cst_13 [1] : vector<1x256xi32> to vector<1xi32>
    %32 = vector.shape_cast %31 : vector<1xi32> to vector<1x1xi32>
    %33 = vector.broadcast %32 : vector<1x1xi32> to vector<1x256xi32>
    %34 = arith.cmpi eq, %1, %33 : vector<1x256xi32>
    %cst_14 = arith.constant 0.000000e+00 : f32
    %35 = vector.shape_cast %34 : vector<1x256xi1> to vector<1x256xi1>
    %36 = vector.broadcast %35 : vector<1x256xi1> to vector<32x256xi1>
    %37 = vector.broadcast %cst_14 : f32 to vector<32x256xf32>
    %38 = arith.select %36, %21, %37 : vector<32x256xi1>, vector<32x256xf32>
    %cst_15 = arith.constant dense<0.000000e+00> : vector<32xf32>
    %39 = vector.multi_reduction <add>, %38, %cst_15 [1] : vector<32x256xf32> to vector<32xf32>
    %40 = vector.shape_cast %39 : vector<32xf32> to vector<32x1xf32>
    %41 = vector.broadcast %40 : vector<32x1xf32> to vector<32x256xf32>
    %42 = arith.mulf %21, %41 : vector<32x256xf32>
    %cst_16 = arith.constant dense<0.000000e+00> : vector<256xf32>
    %43 = vector.multi_reduction <add>, %42, %cst_16 [0] : vector<32x256xf32> to vector<256xf32>
    %44 = vector.shape_cast %43 : vector<256xf32> to vector<1x256xf32>
    %45 = tpu.concatenate %44, %22 in 0 : vector<1x256xf32>, vector<4x256xf32> -> vector<5x256xf32>
    %46 = math.exp %45 : vector<5x256xf32>
    %cst_17 = arith.constant dense<0.000000e+00> : vector<256xf32>
    %47 = vector.multi_reduction <add>, %46, %cst_17 [0] : vector<5x256xf32> to vector<256xf32>
    %48 = vector.shape_cast %47 : vector<256xf32> to vector<1x256xf32>
    %49 = tpu.reciprocal %48 : vector<1x256xf32> -> vector<1x256xf32>
    %50 = vector.broadcast %49 : vector<1x256xf32> to vector<5x256xf32>
    %51 = arith.mulf %46, %50 : vector<5x256xf32>
    %c0_18 = arith.constant 0 : index
    %c0_19 = arith.constant 0 : index
    %c0_20 = arith.constant 0 : index
    %52 = vector.load %arg4[%c0_18, %c0_19, %c0_20] : memref<2x5x256xf32, #tpu.memory_space<vmem>>, vector<1x5x256xf32>
    %53 = vector.shape_cast %52 : vector<1x5x256xf32> to vector<5x256xf32>
    %54 = vector.shape_cast %51 : vector<5x256xf32> to vector<1x5x256xf32>
    tpu.vector_store %arg4[%c0_18, %c0_19, %c0_20], %54 {strides = array<i32>} : memref<2x5x256xf32, #tpu.memory_space<vmem>>, vector<1x5x256xf32>,
    %c1 = arith.constant 1 : index
    %c0_21 = arith.constant 0 : index
    %c0_22 = arith.constant 0 : index
    %55 = vector.load %arg1[%c1, %c0_21, %c0_22] : memref<2x32x256xf32, #tpu.memory_space<vmem>>, vector<1x32x256xf32>
    %56 = vector.shape_cast %55 : vector<1x32x256xf32> to vector<32x256xf32>
    %c1_23 = arith.constant 1 : index
    %c0_24 = arith.constant 0 : index
    %c0_25 = arith.constant 0 : index
    %57 = vector.load %arg2[%c1_23, %c0_24, %c0_25] : memref<2x32x256xf32, #tpu.memory_space<vmem>>, vector<1x32x256xf32>
    %58 = vector.shape_cast %57 : vector<1x32x256xf32> to vector<32x256xf32>
    %59 = arith.mulf %56, %56 : vector<32x256xf32>
    %cst_26 = arith.constant dense<0.000000e+00> : vector<256xf32>
    %60 = vector.multi_reduction <add>, %59, %cst_26 [0] : vector<32x256xf32> to vector<256xf32>
    %61 = vector.shape_cast %60 : vector<256xf32> to vector<1x256xf32>
    %cst_27 = arith.constant 9.99999968E-21 : f32
    %62 = vector.broadcast %cst_27 : f32 to vector<1x256xf32>
    %63 = arith.maximumf %61, %62 : vector<1x256xf32>
    %64 = math.rsqrt %63 : vector<1x256xf32>
    %65 = vector.broadcast %64 : vector<1x256xf32> to vector<32x256xf32>
    %66 = arith.mulf %56, %65 : vector<32x256xf32>
    %67 = arith.mulf %58, %58 : vector<32x256xf32>
    %cst_28 = arith.constant dense<0.000000e+00> : vector<256xf32>
    %68 = vector.multi_reduction <add>, %67, %cst_28 [0] : vector<32x256xf32> to vector<256xf32>
    %69 = vector.shape_cast %68 : vector<256xf32> to vector<1x256xf32>
    %cst_29 = arith.constant 9.99999968E-21 : f32
    %70 = vector.broadcast %cst_29 : f32 to vector<1x256xf32>
    %71 = arith.maximumf %69, %70 : vector<1x256xf32>
    %72 = math.rsqrt %71 : vector<1x256xf32>
    %73 = vector.broadcast %72 : vector<1x256xf32> to vector<32x256xf32>
    %74 = arith.mulf %58, %73 : vector<32x256xf32>
    %cst_30 = arith.constant dense<0.000000e+00> : vector<4x256xf32>
    %75 = tpu.matmul %0, %66, %cst_30 {dimension_numbers = #tpu.dot_dimension_numbers<[1], [0], [0], [1], [0, 0, 1, 1], [], []>, precision = #tpu.contract_precision<fp32>} : vector<4x32xf32>, vector<32x256xf32>, vector<4x256xf32> -> vector<4x256xf32>
    %cst_31 = arith.constant dense<0.000000e+00> : vector<256xf32>
    %76 = vector.multi_reduction <add>, %75, %cst_31 [0] : vector<4x256xf32> to vector<256xf32>
    %77 = vector.shape_cast %76 : vector<256xf32> to vector<1x256xf32>
    %cst_32 = arith.constant dense<0x7F800000> : vector<1xf32>
    %78 = vector.multi_reduction <minimumf>, %77, %cst_32 [1] : vector<1x256xf32> to vector<1xf32>
    %79 = vector.shape_cast %78 : vector<1xf32> to vector<1x1xf32>
    %80 = vector.broadcast %79 : vector<1x1xf32> to vector<1x256xf32>
    %81 = arith.cmpf oeq, %77, %80 : vector<1x256xf32>
    %c256_i32_33 = arith.constant 256 : i32
    %82 = vector.broadcast %c256_i32_33 : i32 to vector<1x256xi32>
    %83 = arith.select %81, %1, %82 : vector<1x256xi1>, vector<1x256xi32>
    %cst_34 = arith.constant dense<2147483647> : vector<1xi32>
    %84 = vector.multi_reduction <minsi>, %83, %cst_34 [1] : vector<1x256xi32> to vector<1xi32>
    %85 = vector.shape_cast %84 : vector<1xi32> to vector<1x1xi32>
    %86 = vector.broadcast %85 : vector<1x1xi32> to vector<1x256xi32>
    %87 = arith.cmpi eq, %1, %86 : vector<1x256xi32>
    %cst_35 = arith.constant 0.000000e+00 : f32
    %88 = vector.shape_cast %87 : vector<1x256xi1> to vector<1x256xi1>
    %89 = vector.broadcast %88 : vector<1x256xi1> to vector<32x256xi1>
    %90 = vector.broadcast %cst_35 : f32 to vector<32x256xf32>
    %91 = arith.select %89, %74, %90 : vector<32x256xi1>, vector<32x256xf32>
    %cst_36 = arith.constant dense<0.000000e+00> : vector<32xf32>
    %92 = vector.multi_reduction <add>, %91, %cst_36 [1] : vector<32x256xf32> to vector<32xf32>
    %93 = vector.shape_cast %92 : vector<32xf32> to vector<32x1xf32>
    %94 = vector.broadcast %93 : vector<32x1xf32> to vector<32x256xf32>
    %95 = arith.mulf %74, %94 : vector<32x256xf32>
    %cst_37 = arith.constant dense<0.000000e+00> : vector<256xf32>
    %96 = vector.multi_reduction <add>, %95, %cst_37 [0] : vector<32x256xf32> to vector<256xf32>
    %97 = vector.shape_cast %96 : vector<256xf32> to vector<1x256xf32>
    %98 = tpu.concatenate %97, %75 in 0 : vector<1x256xf32>, vector<4x256xf32> -> vector<5x256xf32>
    %99 = math.exp %98 : vector<5x256xf32>
    %cst_38 = arith.constant dense<0.000000e+00> : vector<256xf32>
    %100 = vector.multi_reduction <add>, %99, %cst_38 [0] : vector<5x256xf32> to vector<256xf32>
    %101 = vector.shape_cast %100 : vector<256xf32> to vector<1x256xf32>
    %102 = tpu.reciprocal %101 : vector<1x256xf32> -> vector<1x256xf32>
    %103 = vector.broadcast %102 : vector<1x256xf32> to vector<5x256xf32>
    %104 = arith.mulf %99, %103 : vector<5x256xf32>
    %c1_39 = arith.constant 1 : index
    %c0_40 = arith.constant 0 : index
    %c0_41 = arith.constant 0 : index
    %105 = vector.load %arg4[%c1_39, %c0_40, %c0_41] : memref<2x5x256xf32, #tpu.memory_space<vmem>>, vector<1x5x256xf32>
    %106 = vector.shape_cast %105 : vector<1x5x256xf32> to vector<5x256xf32>
    %107 = vector.shape_cast %104 : vector<5x256xf32> to vector<1x5x256xf32>
    tpu.vector_store %arg4[%c1_39, %c0_40, %c0_41], %107 {strides = array<i32>} : memref<2x5x256xf32, #tpu.memory_space<vmem>>, vector<1x5x256xf32>,
    return
  }
  func.func @transform_0(%arg0: i32) -> (i32, i32, i32) {
    %c0_i32 = arith.constant 0 : i32
    %c0_i32_0 = arith.constant 0 : i32
    %c0_i32_1 = arith.constant 0 : i32
    return %arg0, %c0_i32, %c0_i32_0 : i32, i32, i32
  }
  func.func @transform_1(%arg0: i32) -> (i32, i32, i32) {
    %c0_i32 = arith.constant 0 : i32
    %c0_i32_0 = arith.constant 0 : i32
    %c0_i32_1 = arith.constant 0 : i32
    return %arg0, %c0_i32, %c0_i32_0 : i32, i32, i32
  }
  func.func @transform_2(%arg0: i32) -> (i32, i32) {
    %c0_i32 = arith.constant 0 : i32
    %c0_i32_0 = arith.constant 0 : i32
    %c0_i32_1 = arith.constant 0 : i32
    return %c0_i32, %c0_i32_0 : i32, i32
  }
  func.func @transform_3(%arg0: i32) -> (i32, i32, i32) {
    %c0_i32 = arith.constant 0 : i32
    %c0_i32_0 = arith.constant 0 : i32
    %c0_i32_1 = arith.constant 0 : i32
    return %arg0, %c0_i32, %c0_i32_0 : i32, i32, i32
  }
}

</mosaic_0001>

<bundles_post_ra>
// kernel: compute_probs_forward.1
= control target key start
LH: loop header
LB: loop body
LE: loop exit
PB: predicated region body
PF: predicated region fallthrough
CT: control target
= control target key end

     0   :  { %s1683_s12 = smov 0   ;;  %s2317_s0 = inlined_call_operand.vmem [shape: f32[4,32,256], index: 0, kind: input, shape index: {}]   ;;  %s2318_s1 = inlined_call_operand.vmem [shape: f32[4,32,256], index: 1, kind: input, shape index: {}]   ;;  %s2319_s2 = inlined_call_operand.vmem [shape: f32[4,32], index: 2, kind: input, shape index: {}]   ;;  %s2320_s3 = inlined_call_operand.vmem [shape: f32[4,5,256], index: 3, kind: output, shape index: {}]  }
   0x1 LB: > { %s1578_s13 = sadd.s32 4294967295, %s1661_s12   ;;  %p1582_p0 = scmp.ge.s32.totalorder %s1661_s12, 1  ;;  %s1661_s12 = sphi %s1683_s12, %s13_s12  }
   0x2   : > { %p151_p1 = scmp.lt.s32.totalorder %s1661_s12, 3 }
   0x4   : > { %p152_p2 = pnand %p1582_p0, %p151_p1 }
   0x5   : > { %s1583_s14 = sshll.u32 (!%p152_p2), %s1578_s13, 1 }
   0x6   : > { %155 = sbr.rel (%p152_p2) target bundleno = 822 (0x336), region = 32  ;;  %p184_p3 = scmp.lt.s32.totalorder (!%p152_p2), %s1583_s14, 3 }
   0xb   : > { %s2326_s14 = smov (!%p184_p3, %s1583_s14), 3  ;;  %v204_v58 = vld [vmem:[%s2319_s2] sm:$0xf]  ;;  %vm336_vm0 = vcmask 261120   ;;  %vm710_vm13 = vcmask 1043456  }
   0xc   : > { %s1612_s15 = sshll.u32 %s2326_s14, 6  ;;  %s1614_s24 = sshll.u32 %s2326_s14, 4 }
   0xd   : > { %s188_s18 = scalar_lea.vmem %s2317_s0, %s1612_s15  ;;  %s2083_s23 = scalar_lea.vmem %s2318_s1, %s1612_s15 }
   0xe   : > { %v1699_v0 = vld [vmem:[%s188_s18] sm:$0xff]  ;;  %v1701_v1 = vld [vmem:[%s188_s18 + $0x10] sm:$0xff]  ;;  %v1713_v7 = vld [vmem:[%s188_s18 + $0x8] sm:$0xff]  ;;  %s202_s27 = scalar_lea.vmem %s2320_s3, %s1614_s24 }
   0xf   : > { %v1703_v2 = vld [vmem:[%s188_s18 + $0x20] sm:$0xff]  ;;  %v1705_v3 = vld [vmem:[%s188_s18 + $0x30] sm:$0xff]  ;;  %v224_v4 = vmul.f32 %v1699_v0, %v1699_v0  ;;  %v226_v5 = vmul.f32 %v1701_v1, %v1701_v1  ;;  %v1715_v8 = vld [vmem:[%s188_s18 + $0x18] sm:$0xff]  ;;  %v225_v11 = vmul.f32 %v1713_v7, %v1713_v7 }
  0x10   : > { %v228_v6 = vmul.f32 %v1703_v2, %v1703_v2  ;;  %v1717_v9 = vld [vmem:[%s188_s18 + $0x28] sm:$0xff]  ;;  %v1719_v10 = vld [vmem:[%s188_s18 + $0x38] sm:$0xff]  ;;  %v227_v12 = vmul.f32 %v1715_v8, %v1715_v8  ;;  %v1725_v13 = vld [vmem:[%s188_s18 + $0x40] sm:$0xff]  ;;  %v230_v14 = vmul.f32 %v1705_v3, %v1705_v3 }
  0x11   : > { %v232_v15 = vadd.f32 %v226_v5, %v224_v4  ;;  %v229_v16 = vmul.f32 %v1717_v9, %v1717_v9  ;;  %v1731_v17 = vld [vmem:[%s188_s18 + $0x50] sm:$0xff]  ;;  %v1733_v18 = vld [vmem:[%s188_s18 + $0x60] sm:$0xff]  ;;  %v878_v20 = vmul.f32 %v1725_v13, %v1725_v13  ;;  %v231_v21 = vmul.f32 %v1719_v10, %v1719_v10  ;;  %v1745_v25 = vld [vmem:[%s188_s18 + $0x48] sm:$0xff] }
  0x12   : > { %v1735_v19 = vld [vmem:[%s188_s18 + $0x70] sm:$0xff]  ;;  %v241_v22 = vadd.f32 %v227_v12, %v225_v11  ;;  %v880_v23 = vmul.f32 %v1731_v17, %v1731_v17  ;;  %v882_v24 = vmul.f32 %v1733_v18, %v1733_v18  ;;  %v1747_v26 = vld [vmem:[%s188_s18 + $0x58] sm:$0xff]  ;;  %v1749_v27 = vld [vmem:[%s188_s18 + $0x68] sm:$0xff]  ;;  %v879_v30 = vmul.f32 %v1745_v25, %v1745_v25 }
  0x13   : > { %v233_v28 = vadd.f32 %v232_v15, %v228_v6  ;;  %v1751_v29 = vld [vmem:[%s188_s18 + $0x78] sm:$0xff]  ;;  %v881_v31 = vmul.f32 %v1747_v26, %v1747_v26  ;;  %v883_v32 = vmul.f32 %v1749_v27, %v1749_v27  ;;  %v884_v34 = vmul.f32 %v1735_v19, %v1735_v19 }
  0x14   : > { %v242_v33 = vadd.f32 %v241_v22, %v229_v16  ;;  %v886_v35 = vadd.f32 %v880_v23, %v878_v20  ;;  %v885_v37 = vmul.f32 %v1751_v29, %v1751_v29  ;;  %v338_v4 = vsel %vm336_vm0, %v204_v58, 0 }
  0x15   : > { %v234_v36 = vadd.f32 %v233_v28, %v230_v14  ;;  %v895_v38 = vadd.f32 %v881_v31, %v879_v30  ;;  %v1766_v16 = vand.u32 4294901760, %v338_v4 }
  0x16   : > { %v243_v39 = vadd.f32 %v242_v33, %v231_v21  ;;  %v887_v40 = vadd.f32 %v886_v35, %v882_v24 }
  0x17   : > { %v235_v41 = vrot.slane %v234_v36, 4  ;;  %v896_v42 = vadd.f32 %v895_v38, %v883_v32  ;;  %v1774_v23 = vsub.f32 %v338_v4, %v1766_v16 }
  0x18   : > { %v244_v43 = vrot.slane %v243_v39, 4  ;;  %v888_v44 = vadd.f32 %v887_v40, %v884_v34 }
  0x19   : > { %v236_v45 = vadd.f32 %v235_v41, %v234_v36  ;;  %v897_v46 = vadd.f32 %v896_v42, %v885_v37  ;;  %v1778_v31 = vand.u32 4294901760, %v1774_v23 }
  0x1a   : > { %v245_v47 = vadd.f32 %v244_v43, %v243_v39  ;;  %v889_v48 = vrot.slane %v888_v44, 4 }
  0x1b   : > { %v237_v49 = vrot.slane %v236_v45, 2  ;;  %v898_v50 = vrot.slane %v897_v46, 4  ;;  %v363_v39 = vsub.f32 %v1774_v23, %v1778_v31 }
  0x1c   : > { %v246_v51 = vrot.slane %v245_v47, 2  ;;  %v890_v52 = vadd.f32 %v889_v48, %v888_v44 }
  0x1d   : > { %v238_v53 = vadd.f32 %v237_v49, %v236_v45  ;;  %v899_v54 = vadd.f32 %v898_v50, %v897_v46  ;;  %v1791_v50 = vand.u32 4294901760, %v363_v39 }
  0x1e   : > { %v247_v55 = vadd.f32 %v246_v51, %v245_v47  ;;  %v891_v56 = vrot.slane %v890_v52, 2 }
  0x1f   : > { %v239_v57 = vrot.slane %v238_v53, 1  ;;  %v900_v59 = vrot.slane %v899_v54, 2 }
  0x20   : > { %v248_v60 = vrot.slane %v247_v55, 1  ;;  %v892_v61 = vadd.f32 %v891_v56, %v890_v52 }
  0x21   : > { %v240_v62 = vadd.f32 %v239_v57, %v238_v53  ;;  %v901_v63 = vadd.f32 %v900_v59, %v899_v54 }
  0x22   : > { %v249_v5 = vadd.f32 %v248_v60, %v247_v55  ;;  %v893_v6 = vrot.slane %v892_v61, 1 }
  0x23   : > { %v250_v11 = vmax.f32 %v240_v62, 1e-20  ;;  %v902_v12 = vrot.slane %v901_v63, 1 }
  0x24   : > { %v251_v14 = vmax.f32 %v249_v5, 1e-20  ;;  %v894_v15 = vadd.f32 %v893_v6, %v892_v61 }
  0x25   : > { %1623 = vrsqrt.f32 %v250_v11  ;;  %v903_v20 = vadd.f32 %v902_v12, %v901_v63  ;;  %vm258_vm1 = vweird.f32 %v250_v11 }
  0x26   : > { %1625 = vrsqrt.f32 %v251_v14  ;;  %v1768_v21 = vmax.f32 %v894_v15, 1e-20  ;;  %vm268_vm3 = vweird.f32 %v251_v14 }
  0x27   : > { %v1770_v22 = vmax.f32 %v903_v20, 1e-20 }
  0x28   : > { %1627 = vrsqrt.f32 %v1768_v21  ;;  %vm912_vm7 = vweird.f32 %v1768_v21 }
  0x29   : > { %1629 = vrsqrt.f32 %v1770_v22  ;;  %vm922_vm10 = vweird.f32 %v1770_v22 }
  0x2b   : > { %v1624_v24 = vpop.eup %1623 }
  0x2c   : > { %v1626_v28 = vpop.eup %1625  ;;  %v253_v30 = vmul.f32 %v1624_v24, %v250_v11  ;;  %vm259_vm2 = vweird.f32 %v1624_v24 }
  0x2d   : > { %v263_v32 = vmul.f32 %v1626_v28, %v251_v14  ;;  %vm269_vm4 = vweird.f32 %v1626_v28  ;;  %vm260_vm5 = vmor %vm258_vm1, %vm259_vm2 }
  0x2e   : > { %v1780_v33 = vpop.eup %1627  ;;  %v254_v34 = vmul.f32 %v1624_v24, %v253_v30  ;;  %vm270_vm6 = vmor %vm268_vm3, %vm269_vm4 }
  0x2f   : > { %v1782_v35 = vpop.eup %1629  ;;  %v264_v36 = vmul.f32 %v1626_v28, %v263_v32  ;;  %v907_v37 = vmul.f32 %v1780_v33, %v1768_v21  ;;  %vm913_vm8 = vweird.f32 %v1780_v33 }
  0x30   : > { %v255_v38 = vmul.f32 0.5, %v254_v34  ;;  %v917_v43 = vmul.f32 %v1782_v35, %v1770_v22  ;;  %vm1859_vm9 = vmor %vm912_vm7, %vm913_vm8  ;;  %vm923_vm11 = vweird.f32 %v1782_v35 }
  0x31   : > { %v265_v40 = vmul.f32 0.5, %v264_v36  ;;  %v908_v41 = vmul.f32 %v1780_v33, %v907_v37  ;;  %vm924_vm12 = vmor %vm922_vm10, %vm923_vm11 }
  0x32   : > { %v256_v42 = vsub.f32 1.5, %v255_v38  ;;  %v918_v51 = vmul.f32 %v1782_v35, %v917_v43 }
  0x33   : > { %v266_v44 = vsub.f32 1.5, %v265_v40  ;;  %v909_v45 = vmul.f32 0.5, %v908_v41 }
  0x34   : > { %v257_v46 = vmul.f32 %v1624_v24, %v256_v42  ;;  %v919_v5 = vmul.f32 0.5, %v918_v51 }
  0x35   : > { %v267_v47 = vmul.f32 %v1626_v28, %v266_v44  ;;  %v910_v48 = vsub.f32 1.5, %v909_v45 }
  0x36   : > { %v261_v49 = vsel %vm260_vm5, %v1624_v24, %v257_v46  ;;  %v920_v45 = vsub.f32 1.5, %v919_v5 }
  0x37   : > { %v278_v52 = vmul.f32 %v261_v49, %v1705_v3  ;;  %v276_v53 = vmul.f32 %v261_v49, %v1703_v2  ;;  %v274_v54 = vmul.f32 %v261_v49, %v1701_v1  ;;  %v272_v55 = vmul.f32 %v261_v49, %v1699_v0 }
  0x38   : > { %v271_v56 = vsel %vm270_vm6, %v1626_v28, %v267_v47  ;;  %v911_v57 = vmul.f32 %v1780_v33, %v910_v48 }
  0x39   : > { %v1801_v58 = vand.u32 4294901760, %v278_v52  ;;  %v1803_v59 = vand.u32 4294901760, %v276_v53  ;;  %v1805_v60 = vand.u32 4294901760, %v274_v54  ;;  %v1807_v3 = vand.u32 4294901760, %v272_v55 }
  0x3a   : > { %v279_v2 = vmul.f32 %v271_v56, %v1719_v10  ;;  %v277_v1 = vmul.f32 %v271_v56, %v1717_v9  ;;  %v275_v0 = vmul.f32 %v271_v56, %v1715_v8  ;;  %v273_v61 = vmul.f32 %v271_v56, %v1713_v7 }
  0x3b   : > { %353 = vmatpush.msra.mxu0 %v1801_v58  ;;  %v382_v62 = vsub.f32 %v278_v52, %v1801_v58  ;;  %453 = vmatpush.msra.mxu3 %v1801_v58  ;;  %v1817_v63 = vsub.f32 %v276_v53, %v1803_v59  ;;  %v1820_v4 = vsub.f32 %v274_v54, %v1805_v60 }
  0x3c   : > { %v1823_v10 = vsub.f32 %v272_v55, %v1807_v3  ;;  %v1825_v9 = vand.u32 4294901760, %v279_v2  ;;  %v1827_v8 = vand.u32 4294901760, %v277_v1  ;;  %v1829_v7 = vand.u32 4294901760, %v275_v0 }
  0x3d   : > { %424 = vmatpush.msra.mxu2 %v382_v62  ;;  %355 = vmatpush.msra.mxu0 %v1803_v59  ;;  %v383_v6 = vand.u32 4294901760, %v382_v62  ;;  %v389_v11 = vand.u32 4294901760, %v1817_v63  ;;  %v395_v12 = vand.u32 4294901760, %v1820_v4  ;;  %v1834_v14 = vand.u32 4294901760, %v273_v61 }
  0x3e   : > { %455 = vmatpush.msra.mxu3 %v1803_v59  ;;  %v1838_v15 = vsub.f32 %v279_v2, %v1825_v9  ;;  %v401_v20 = vand.u32 4294901760, %v1823_v10  ;;  %v1842_v24 = vsub.f32 %v277_v1, %v1827_v8  ;;  %v1845_v28 = vsub.f32 %v275_v0, %v1829_v7 }
  0x3f   : > { %427 = vmatpush.msra.mxu2 %v1817_v63  ;;  %357 = vmatpush.msra.mxu0 %v1805_v60  ;;  %v384_v30 = vsub.f32 %v382_v62, %v383_v6  ;;  %v390_v32 = vsub.f32 %v1817_v63, %v389_v11  ;;  %v396_v34 = vsub.f32 %v1820_v4, %v395_v12 }
  0x40   : > { %457 = vmatpush.msra.mxu3 %v1805_v60  ;;  %v568_v36 = vand.u32 4294901760, %v1838_v15  ;;  %v574_v37 = vand.u32 4294901760, %v1842_v24  ;;  %v580_v38 = vand.u32 4294901760, %v1845_v28  ;;  %v402_v42 = vsub.f32 %v1823_v10, %v401_v20 }
  0x41   : > { %v385_v40 = vand.u32 4294901760, %v384_v30  ;;  %430 = vmatpush.msra.mxu2 %v1820_v4  ;;  %359 = vmatpush.msra.mxu0 %v1807_v3  ;;  %v391_v41 = vand.u32 4294901760, %v390_v32  ;;  %v1867_v43 = vsub.f32 %v273_v61, %v1834_v14  ;;  %v397_v46 = vand.u32 4294901760, %v396_v34 }
  0x42   : > { %459 = vmatpush.msra.mxu3 %v1807_v3  ;;  %365 = vmatmul.f32.vlgmr.msra.gmra.mxu0 %v1791_v50  ;;  %v569_v21 = vsub.f32 %v1838_v15, %v568_v36  ;;  %v575_v44 = vsub.f32 %v1842_v24, %v574_v37  ;;  %v581_v47 = vsub.f32 %v1845_v28, %v580_v38  ;;  %v403_v53 = vand.u32 4294901760, %v402_v42 }
  0x43   : > { %386 = vmatpush.msra.mxu1 %v385_v40  ;;  %433 = vmatpush.msra.mxu2 %v1823_v10  ;;  %v586_v48 = vand.u32 4294901760, %v1867_v43  ;;  %v915_v49 = vsel %vm1859_vm9, %v1780_v33, %v911_v57  ;;  %v921_v55 = vmul.f32 %v1782_v35, %v920_v45 }
  0x44   : > { %436 = vmatmul.f32.vlgmr.msra.gmra.mxu2 %v1774_v23  ;;  %463 = vmatmul.f32.vlgmr.msra.gmra.mxu3 %v1778_v31  ;;  %v570_v51 = vand.u32 4294901760, %v569_v21  ;;  %v576_v52 = vand.u32 4294901760, %v575_v44  ;;  %v932_v33 = vmul.f32 %v1735_v19, %v915_v49  ;;  %v582_v22 = vand.u32 4294901760, %v581_v47 }
  0x45   : > { %392 = vmatpush.msra.mxu1 %v391_v41  ;;  %538 = vmatpush.msrb.mxu2 %v1825_v9  ;;  %v587_v54 = vsub.f32 %v1867_v43, %v586_v48  ;;  %v930_v56 = vmul.f32 %v1733_v18, %v915_v49  ;;  %v928_v19 = vmul.f32 %v1731_v17, %v915_v49 }
  0x46   : > { %482 = vmatpush.msrb.mxu0 %v383_v6  ;;  %571 = vmatpush.msrb.mxu3 %v570_v51  ;;  %v1899_v2 = vand.u32 4294901760, %v932_v33  ;;  %v925_v1 = vsel %vm924_vm12, %v1782_v35, %v921_v55  ;;  %v926_v0 = vmul.f32 %v1725_v13, %v915_v49 }
  0x47   : > { %398 = vmatpush.msra.mxu1 %v397_v46  ;;  %540 = vmatpush.msrb.mxu2 %v1827_v8  ;;  %v588_v57 = vand.u32 4294901760, %v587_v54  ;;  %v1905_v18 = vand.u32 4294901760, %v930_v56  ;;  %v933_v61 = vmul.f32 %v1751_v29, %v925_v1  ;;  %v1915_v35 = vand.u32 4294901760, %v928_v19 }
  0x48   : > { %486 = vmatpush.msrb.mxu0 %v389_v11  ;;  %577 = vmatpush.msrb.mxu3 %v576_v52  ;;  %v1913_v17 = vsub.f32 %v932_v33, %v1899_v2  ;;  %v1928_v29 = vand.u32 4294901760, %v926_v0  ;;  %v927_v63 = vmul.f32 %v1745_v25, %v925_v1 }
  0x49   : > { %404 = vmatpush.msra.mxu1 %v403_v53  ;;  %542 = vmatpush.msrb.mxu2 %v1829_v7  ;;  %v1924_v13 = vsub.f32 %v930_v56, %v1905_v18  ;;  %v1938_v62 = vsub.f32 %v928_v19, %v1915_v35 }
  0x4a   : > { %406 = vmatmul.f32.vlgmr.msra.gmra.mxu1 %v1766_v16  ;;  %490 = vmatpush.msrb.mxu0 %v395_v12  ;;  %v1952_v4 = vsub.f32 %v926_v0, %v1928_v29  ;;  %v1971_v11 = vand.u32 4294901760, %v927_v63 }
  0x4b   : > { %513 = vmatpush.msrb.mxu1 %v1801_v58  ;;  %583 = vmatpush.msrb.mxu3 %v582_v22  ;;  %v931_v58 = vmul.f32 %v1749_v27, %v925_v1  ;;  %v1033_v27 = vand.u32 4294901760, %v1913_v17 }
  0x4c   : > { %544 = vmatpush.msrb.mxu2 %v1834_v14  ;;  %494 = vmatpush.msrb.mxu0 %v401_v20  ;;  %v1992_v30 = vsub.f32 %v927_v63, %v1971_v11 }
  0x4d   : > { %515 = vmatpush.msrb.mxu1 %v1803_v59  ;;  %589 = vmatpush.msrb.mxu3 %v588_v57  ;;  %v1930_v59 = vand.u32 4294901760, %v933_v61  ;;  %v1034_v25 = vsub.f32 %v1913_v17, %v1033_v27 }
  0x4e   : > { %496 = vmatmul.f32.vlgmr.msrb.gmra.mxu0 %v1766_v16  ;;  %550 = vmatmul.f32.vlgmr.msrb.gmra.mxu2 %v1791_v50  ;;  %v1236_v39 = vand.u32 4294901760, %v1992_v30 }
  0x4f   : > { %517 = vmatpush.msrb.mxu1 %v1805_v60  ;;  %591 = vmatmul.f32.vlgmr.msrb.gmra.mxu3 %v1766_v16  ;;  %v929_v60 = vmul.f32 %v1747_v26, %v925_v1  ;;  %v1039_v26 = vand.u32 4294901760, %v1924_v13  ;;  %v1955_v5 = vsub.f32 %v933_v61, %v1930_v59 }
  0x50   : > { %667 = vmatpush.msra.mxu2 %v568_v36  ;;  %609 = vmatpush.msra.mxu0 %v1838_v15  ;;  %v1051_v15 = vand.u32 4294901760, %v1952_v4  ;;  %v1237_v21 = vsub.f32 %v1992_v30, %v1236_v39 }
  0x51   : > { %698 = vmatpush.msra.mxu3 %v1825_v9  ;;  %519 = vmatpush.msrb.mxu1 %v1807_v3  ;;  %v1942_v3 = vand.u32 4294901760, %v931_v58  ;;  %v1957_v10 = vand.u32 4294901760, %v929_v60  ;;  %v1218_v12 = vand.u32 4294901760, %v1955_v5 }
  0x52   : > { %671 = vmatpush.msra.mxu2 %v574_v37  ;;  %612 = vmatpush.msra.mxu0 %v1842_v24  ;;  %v1052_v36 = vsub.f32 %v1952_v4, %v1051_v15  ;;  %v1238_v45 = vand.u32 4294901760, %v1237_v21 }
  0x53   : > { %700 = vmatpush.msra.mxu3 %v1827_v8  ;;  %521 = vmatmul.f32.vlgmr.msrb.gmra.mxu1 %v1766_v16  ;;  %v1969_v6 = vsub.f32 %v931_v58, %v1942_v3  ;;  %v1983_v20 = vsub.f32 %v929_v60, %v1957_v10  ;;  %v1219_v34 = vsub.f32 %v1955_v5, %v1218_v12 }
  0x54   : > { %638 = vmatpush.msra.mxu1 %v1825_v9  ;;  %675 = vmatpush.msra.mxu2 %v580_v38  ;;  %v1045_v9 = vand.u32 4294901760, %v1938_v62  ;;  %v1053_v41 = vand.u32 4294901760, %v1052_v36 }
  0x55   : > { %615 = vmatpush.msra.mxu0 %v1845_v28  ;;  %702 = vmatpush.msra.mxu3 %v1829_v7  ;;  %v1224_v28 = vand.u32 4294901760, %v1969_v6  ;;  %v1220_v40 = vand.u32 4294901760, %v1219_v34 }
  0x56   : > { %640 = vmatpush.msra.mxu1 %v1827_v8  ;;  %679 = vmatpush.msra.mxu2 %v586_v48  ;;  %v1040_v8 = vsub.f32 %v1924_v13, %v1039_v26  ;;  %v1046_v24 = vsub.f32 %v1938_v62, %v1045_v9 }
  0x57   : > { %618 = vmatpush.msra.mxu0 %v1867_v43  ;;  %704 = vmatpush.msra.mxu3 %v1834_v14  ;;  %v1225_v38 = vsub.f32 %v1969_v6, %v1224_v28 }
  0x58   : > { %621 = vmatmul.f32.vlgmr.msra.gmra.mxu0 %v1774_v23  ;;  %642 = vmatpush.msra.mxu1 %v1829_v7  ;;  %v1035_v7 = vand.u32 4294901760, %v1034_v25  ;;  %v1041_v32 = vand.u32 4294901760, %v1040_v8  ;;  %v1047_v37 = vand.u32 4294901760, %v1046_v24 }
  0x59   : > { %681 = vmatmul.f32.vlgmr.msra.gmra.mxu2 %v1766_v16  ;;  %706 = vmatmul.f32.vlgmr.msra.gmra.mxu3 %v1766_v16  ;;  %v1226_v43 = vand.u32 4294901760, %v1225_v38 }
  0x5a   : > { %1074 = vmatpush.msrb.mxu2 %v1913_v17  ;;  %1003 = vmatpush.msrb.mxu0 %v1899_v2 }
  0x5b   : > { %1103 = vmatpush.msrb.mxu3 %v1899_v2  ;;  %644 = vmatpush.msra.mxu1 %v1834_v14  ;;  %v1230_v14 = vand.u32 4294901760, %v1983_v20 }
  0x5c   : > { %1077 = vmatpush.msrb.mxu2 %v1924_v13  ;;  %1005 = vmatpush.msrb.mxu0 %v1905_v18 }
  0x5d   : > { %1105 = vmatpush.msrb.mxu3 %v1905_v18  ;;  %648 = vmatmul.f32.vlgmr.msra.gmra.mxu1 %v1778_v31  ;;  %v1231_v42 = vsub.f32 %v1983_v20, %v1230_v14 }
  0x5e   : > { %1036 = vmatpush.msrb.mxu1 %v1035_v7  ;;  %1080 = vmatpush.msrb.mxu2 %v1938_v62 }
  0x5f   : > { %1007 = vmatpush.msrb.mxu0 %v1915_v35  ;;  %1107 = vmatpush.msrb.mxu3 %v1915_v35  ;;  %v1232_v44 = vand.u32 4294901760, %v1231_v42 }
  0x60   : > { %1042 = vmatpush.msrb.mxu1 %v1041_v32  ;;  %1083 = vmatpush.msrb.mxu2 %v1952_v4 }
  0x61   : > { %1009 = vmatpush.msrb.mxu0 %v1928_v29  ;;  %1109 = vmatpush.msrb.mxu3 %v1928_v29 }
  0x62   : > { %1015 = vmatmul.f32.vlgmr.msrb.gmra.mxu0 %v1791_v50  ;;  %1048 = vmatpush.msrb.mxu1 %v1047_v37 }
  0x63   : > { %1086 = vmatmul.f32.vlgmr.msrb.gmra.mxu2 %v1774_v23  ;;  %1113 = vmatmul.f32.vlgmr.msrb.gmra.mxu3 %v1778_v31 }
  0x64   : > { %1188 = vmatpush.msra.mxu2 %v1930_v59  ;;  %1132 = vmatpush.msra.mxu0 %v1033_v27 }
  0x65   : > { %1221 = vmatpush.msra.mxu3 %v1220_v40  ;;  %1054 = vmatpush.msrb.mxu1 %v1053_v41 }
  0x66   : > { %1190 = vmatpush.msra.mxu2 %v1942_v3  ;;  %1136 = vmatpush.msra.mxu0 %v1039_v26 }
  0x67   : > { %1227 = vmatpush.msra.mxu3 %v1226_v43  ;;  %1056 = vmatmul.f32.vlgmr.msrb.gmra.mxu1 %v1766_v16 }
  0x68   : > { %1163 = vmatpush.msra.mxu1 %v1899_v2  ;;  %1192 = vmatpush.msra.mxu2 %v1957_v10 }
  0x69   : > { %1140 = vmatpush.msra.mxu0 %v1045_v9  ;;  %1233 = vmatpush.msra.mxu3 %v1232_v44 }
  0x6a   : > { %1165 = vmatpush.msra.mxu1 %v1905_v18  ;;  %1194 = vmatpush.msra.mxu2 %v1971_v11 }
  0x6b   : > { %1144 = vmatpush.msra.mxu0 %v1051_v15  ;;  %1239 = vmatpush.msra.mxu3 %v1238_v45 }
  0x6c   : > { %1146 = vmatmul.f32.vlgmr.msra.gmra.mxu0 %v1766_v16  ;;  %1167 = vmatpush.msra.mxu1 %v1915_v35 }
  0x6d   : > { %1200 = vmatmul.f32.vlgmr.msra.gmra.mxu2 %v1791_v50  ;;  %1241 = vmatmul.f32.vlgmr.msra.gmra.mxu3 %v1766_v16 }
  0x6e   : > { %1317 = vmatpush.msrb.mxu2 %v1218_v12  ;;  %1259 = vmatpush.msrb.mxu0 %v1955_v5 }
  0x6f   : > { %1169 = vmatpush.msra.mxu1 %v1928_v29  ;;  %1348 = vmatpush.msrb.mxu3 %v1930_v59 }
  0x70   : > { %1321 = vmatpush.msrb.mxu2 %v1224_v28  ;;  %1262 = vmatpush.msrb.mxu0 %v1969_v6 }
  0x71   : > { %1171 = vmatmul.f32.vlgmr.msra.gmra.mxu1 %v1766_v16  ;;  %1350 = vmatpush.msrb.mxu3 %v1942_v3 }
  0x72   : > { %1288 = vmatpush.msrb.mxu1 %v1930_v59  ;;  %1325 = vmatpush.msrb.mxu2 %v1230_v14 }
  0x73   : > { %1265 = vmatpush.msrb.mxu0 %v1983_v20  ;;  %1352 = vmatpush.msrb.mxu3 %v1957_v10 }
  0x74   : > { %1290 = vmatpush.msrb.mxu1 %v1942_v3  ;;  %1329 = vmatpush.msrb.mxu2 %v1236_v39 }
  0x75   : > { %1268 = vmatpush.msrb.mxu0 %v1992_v30  ;;  %1331 = vmatmul.f32.vlgmr.msrb.gmra.mxu2 %v1766_v16 }
  0x76   : > { %1271 = vmatmul.f32.vlgmr.msrb.gmra.mxu0 %v1774_v23  ;;  %1292 = vmatpush.msrb.mxu1 %v1957_v10 }
  0x77   : > { %1354 = vmatpush.msrb.mxu3 %v1971_v11 }
  0x78   : > { %1294 = vmatpush.msrb.mxu1 %v1971_v11  ;;  %1356 = vmatmul.f32.vlgmr.msrb.gmra.mxu3 %v1766_v16 }
  0x79   : > { %1298 = vmatmul.f32.vlgmr.msrb.gmra.mxu1 %v1778_v31 }
  0xbf   : > { %v366_v50 = vpop.f32.mrf.mxu0 }
  0xc7   : > { %v407_v46 = vpop.f32.mrf.mxu1  ;;  %v437_v47 = vpop.f32.mrf.mxu2 }
  0xc8   : > { %v408_v48 = vadd.f32 %v407_v46, %v366_v50  ;;  %v464_v49 = vpop.f32.mrf.mxu3 }
  0xca   : > { %v438_v51 = vadd.f32 %v437_v47, %v408_v48 }
  0xcb   : > { %v497_v52 = vpop.f32.mrf.mxu0 }
  0xcc   : > { %v465_v53 = vadd.f32 %v464_v49, %v438_v51 }
  0xce   : > { %v498_v54 = vadd.f32 %v497_v52, %v465_v53 }
  0xd0   : > { %v522_v23 = vpop.f32.mrf.mxu1 }
  0xd1   : > { %v2047_v33 = vadd.f32 %v522_v23, %v498_v54  ;;  %v551_v55 = vpop.f32.mrf.mxu2 }
  0xd2   : > { %v592_v22 = vpop.f32.mrf.mxu3 }
  0xd3   : > { %v711_v16 = vsel %vm710_vm13, %v2047_v33, 0.0  ;;  %v593_v56 = vadd.f32 %v592_v22, %v551_v55  ;;  %v205_v55 = vlaneseq }
  0xd4   : > { %v712_v57 = vrot.slane %v711_v16, 4 }
  0xd5   : > { %v622_v31 = vpop.f32.mrf.mxu0  ;;  %v2063_v22 = vand.u32 127, %v205_v55 }
  0xd6   : > { %v623_v2 = vadd.f32 %v622_v31, %v593_v56  ;;  %v713_v18 = vadd.f32 %v712_v57, %v711_v16 }
  0xd7   : > { %v2066_v16 = vadd.s32 128, %v2063_v22 }
  0xd8   : > { %v714_v13 = vrot.slane %v713_v18, 2 }
  0xda   : > { %v649_v19 = vpop.f32.mrf.mxu1  ;;  %v715_v62 = vadd.f32 %v714_v13, %v713_v18 }
  0xdb   : > { %v650_v1 = vadd.f32 %v649_v19, %v623_v2 }
  0xdc   : > { %v682_v0 = vpop.f32.mrf.mxu2  ;;  %v707_v61 = vpop.f32.mrf.mxu3  ;;  %v716_v10 = vrot.slane %v715_v62, 1 }
  0xdd   : > { %v683_v17 = vadd.f32 %v682_v0, %v650_v1 }
  0xde   : > { %v717_v12 = vadd.f32 %v716_v10, %v715_v62  ;;  %v2092_v10 = vld [vmem:[%s2083_s23 + $0x10] sm:$0xff] }
  0xdf   : > { %v2051_v35 = vadd.f32 %v707_v61, %v683_v17  ;;  %v1016_v58 = vpop.f32.mrf.mxu0 }
  0xe1   : > { %v718_v29 = vsel %vm710_vm13, %v2051_v35, 0.0 }
  0xe2   : > { %v719_v59 = vrot.slane %v718_v29, 4 }
  0xe4   : > { %v720_v60 = vadd.f32 %v719_v59, %v718_v29  ;;  %v1057_v27 = vpop.f32.mrf.mxu1 }
  0xe5   : > { %v1058_v3 = vadd.f32 %v1057_v27, %v1016_v58 }
  0xe6   : > { %v721_v63 = vrot.slane %v720_v60, 2  ;;  %v1087_v26 = vpop.f32.mrf.mxu2  ;;  %v1114_v4 = vpop.f32.mrf.mxu3 }
  0xe7   : > { %v1088_v5 = vadd.f32 %v1087_v26, %v1058_v3 }
  0xe8   : > { %v722_v25 = vadd.f32 %v721_v63, %v720_v60 }
  0xe9   : > { %v1115_v9 = vadd.f32 %v1114_v4, %v1088_v5  ;;  %v1147_v6 = vpop.f32.mrf.mxu0  ;;  %v2086_v4 = vld [vmem:[%s2083_s23] sm:$0xff]  ;;  %v2089_v5 = vld [vmem:[%s2083_s23 + $0x8] sm:$0xff] }
  0xea   : > { %v723_v11 = vrot.slane %v722_v25, 1 }
  0xeb   : > { %v1148_v8 = vadd.f32 %v1147_v6, %v1115_v9  ;;  %v280_v9 = vmul.f32 %v2086_v4, %v2086_v4  ;;  %v281_v6 = vmul.f32 %v2089_v5, %v2089_v5 }
  0xec   : > { %v724_v15 = vadd.f32 %v723_v11, %v722_v25  ;;  %v2095_v25 = vld [vmem:[%s2083_s23 + $0x18] sm:$0xff]  ;;  %v282_v11 = vmul.f32 %v2092_v10, %v2092_v10 }
  0xee   : > { %v1172_v20 = vpop.f32.mrf.mxu1  ;;  %v725_v7 = vmin.f32 %v717_v12, %v724_v15 }
  0xef   : > { %v2055_v24 = vadd.f32 %v1172_v20, %v1148_v8  ;;  %v2104_v8 = vld [vmem:[%s2083_s23 + $0x20] sm:$0xff] }
  0xf0   : > { %v1201_v28 = vpop.f32.mrf.mxu2  ;;  %v1242_v30 = vpop.f32.mrf.mxu3  ;;  %726 = vmin.xlane.f32.xlu0 %v725_v7  ;;  %v284_v20 = vmul.f32 %v2104_v8, %v2104_v8 }
  0xf1   : > { %v1243_v32 = vadd.f32 %v1242_v30, %v1201_v28  ;;  %v1360_v34 = vsel %vm710_vm13, %v2055_v24, 0.0  ;;  %v288_v28 = vadd.f32 %v282_v11, %v280_v9  ;;  %v2116_v30 = vld [vmem:[%s2083_s23 + $0x30] sm:$0xff] }
  0xf2   : > { %v1361_v14 = vrot.slane %v1360_v34, 4 }
  0xf3   : > { %v1272_v36 = vpop.f32.mrf.mxu0 }
  0xf4   : > { %v1273_v37 = vadd.f32 %v1272_v36, %v1243_v32  ;;  %v1362_v41 = vadd.f32 %v1361_v14, %v1360_v34  ;;  %v2119_v32 = vld [vmem:[%s2083_s23 + $0x38] sm:$0xff]  ;;  %v286_v36 = vmul.f32 %v2116_v30, %v2116_v30 }
  0xf5   : > { %v287_v14 = vmul.f32 %v2119_v32, %v2119_v32 }
  0xf6   : > { %v1299_v38 = vpop.f32.mrf.mxu1  ;;  %v1363_v44 = vrot.slane %v1362_v41, 2 }
  0xf7   : > { %v1300_v39 = vadd.f32 %v1299_v38, %v1273_v37  ;;  %v289_v37 = vadd.f32 %v288_v28, %v284_v20 }
  0xf8   : > { %v1332_v40 = vpop.f32.mrf.mxu2  ;;  %v1364_v47 = vadd.f32 %v1363_v44, %v1362_v41 }
  0xf9   : > { %v1333_v42 = vadd.f32 %v1332_v40, %v1300_v39  ;;  %v290_v39 = vadd.f32 %v289_v37, %v286_v36 }
  0xfa   : > { %v1365_v49 = vrot.slane %v1364_v47, 1 }
  0xfb   : > { %v1357_v43 = vpop.f32.mrf.mxu3  ;;  %v291_v41 = vrot.slane %v290_v39, 4 }
  0xfc   : > { %v2059_v21 = vadd.f32 %v1357_v43, %v1333_v42  ;;  %v1366_v53 = vadd.f32 %v1365_v49, %v1364_v47 }
  0xfd   : > { %v292_v43 = vadd.f32 %v291_v41, %v290_v39 }
  0xfe   : > { %v1367_v45 = vsel %vm710_vm13, %v2059_v21, 0.0 }
  0xff   : > { %v1368_v50 = vrot.slane %v1367_v45, 4 }
 0x101   : > { %v1369_v46 = vadd.f32 %v1368_v50, %v1367_v45  ;;  %v293_v45 = vrot.slane %v292_v43, 2 }
 0x103   : > { %v1370_v48 = vrot.slane %v1369_v46, 2 }
 0x105   : > { %v1371_v51 = vadd.f32 %v1370_v48, %v1369_v46  ;;  %v294_v46 = vadd.f32 %v293_v45, %v292_v43 }
 0x107   : > { %v1372_v52 = vrot.slane %v1371_v51, 1  ;;  %v295_v48 = vrot.slane %v294_v46, 1 }
 0x109   : > { %v1373_v54 = vadd.f32 %v1372_v52, %v1371_v51  ;;  %v2126_v51 = vld [vmem:[%s2083_s23 + $0x40] sm:$0xff]  ;;  %v2129_v52 = vld [vmem:[%s2083_s23 + $0x48] sm:$0xff] }
 0x10a   : > { %v934_v55 = vmul.f32 %v2126_v51, %v2126_v51 }
 0x10b   : > { %v1374_v23 = vmin.f32 %v1366_v53, %v1373_v54 }
 0x10d   : > { %1375 = vmin.xlane.f32.xlu0 %v1374_v23  ;;  %v2135_v23 = vld [vmem:[%s2083_s23 + $0x58] sm:$0xff] }
 0x163   : > { %v727_v56 = vpop.xlane.xlu0 %726 }
 0x164   : > { %vm728_vm14 = vcmp.eq.f32.partialorder %v717_v12, %v727_v56  ;;  %vm729_vm15 = vcmp.eq.f32.partialorder %v724_v15, %v727_v56  ;;  %v2107_v12 = vld [vmem:[%s2083_s23 + $0x28] sm:$0xff]  ;;  %v283_v15 = vmul.f32 %v2095_v25, %v2095_v25  ;;  %v935_v56 = vmul.f32 %v2129_v52, %v2129_v52 }
 0x165   : > { %v730_v31 = vsel %vm728_vm14, %v2063_v22, 256  ;;  %v731_v57 = vsel %vm729_vm15, %v2066_v16, 256  ;;  %v285_v7 = vmul.f32 %v2107_v12, %v2107_v12 }
 0x166   : > { %vm732_vm0 = vcmp.lt.s32.totalorder %v730_v31, %v731_v57  ;;  %v297_v34 = vadd.f32 %v283_v15, %v281_v6 }
 0x167   : > { %v733_v2 = vsel %vm732_vm0, %v730_v31, %v731_v57 }
 0x168   : > { %v735_v19 = vshra.s32 %v733_v2, 16  ;;  %v734_v29 = vand.u32 65535, %v733_v2  ;;  %v298_v38 = vadd.f32 %v297_v34, %v285_v7  ;;  %v2144_v2 = vld [vmem:[%s2083_s23 + $0x60] sm:$0xff] }
 0x16a   : > { %v737_v1 = vcvt.s32.f32 %v735_v19  ;;  %v736_v60 = vcvt.s32.f32 %v734_v29  ;;  %v299_v40 = vadd.f32 %v298_v38, %v287_v14  ;;  %v2147_v19 = vld [vmem:[%s2083_s23 + $0x68] sm:$0xff] }
 0x16c   : > { %738 = vmin.xlane.f32.xlu1 %v737_v1  ;;  %v300_v42 = vrot.slane %v299_v40, 4 }
 0x16e   : > { %v301_v44 = vadd.f32 %v300_v42, %v299_v40 }
 0x170   : > { %v302_v50 = vrot.slane %v301_v44, 2 }
 0x172   : > { %v303_v47 = vadd.f32 %v302_v50, %v301_v44 }
 0x174   : > { %v304_v49 = vrot.slane %v303_v47, 1 }
 0x176   : > { %v305_v57 = vadd.f32 %v304_v49, %v303_v47 }
 0x180   : > { %v1376_v18 = vpop.xlane.xlu0 %1375 }
 0x181   : > { %vm1377_vm1 = vcmp.eq.f32.partialorder %v1366_v53, %v1376_v18  ;;  %vm1378_vm2 = vcmp.eq.f32.partialorder %v1373_v54, %v1376_v18  ;;  %v2132_v53 = vld [vmem:[%s2083_s23 + $0x50] sm:$0xff]  ;;  %v296_v54 = vadd.f32 %v295_v48, %v294_v46  ;;  %v938_v18 = vmul.f32 %v2144_v2, %v2144_v2 }
 0x182   : > { %v1379_v0 = vsel %vm1377_vm1, %v2063_v22, 256  ;;  %v1380_v61 = vsel %vm1378_vm2, %v2066_v16, 256  ;;  %v936_v31 = vmul.f32 %v2132_v53, %v2132_v53 }
 0x183   : > { %vm1381_vm3 = vcmp.lt.s32.totalorder %v1379_v0, %v1380_v61  ;;  %v306_v29 = vmax.f32 %v296_v54, 1e-20 }
 0x184   : > { %v1382_v17 = vsel %vm1381_vm3, %v1379_v0, %v1380_v61  ;;  %v939_v0 = vmul.f32 %v2147_v19, %v2147_v19  ;;  %v942_v61 = vadd.f32 %v936_v31, %v934_v55 }
 0x185   : > { %v1384_v58 = vshra.s32 %v1382_v17, 16  ;;  %v1383_v62 = vand.u32 65535, %v1382_v17  ;;  %v2156_v17 = vld [vmem:[%s2083_s23 + $0x70] sm:$0xff]  ;;  %1631 = vrsqrt.f32 %v306_v29  ;;  %vm314_vm6 = vweird.f32 %v306_v29 }
 0x187   : > { %v1386_v13 = vcvt.s32.f32 %v1384_v58  ;;  %v1385_v63 = vcvt.s32.f32 %v1383_v62  ;;  %v2159_v58 = vld [vmem:[%s2083_s23 + $0x78] sm:$0xff]  ;;  %v943_v62 = vadd.f32 %v942_v61, %v938_v18 }
 0x189   : > { %1387 = vmin.xlane.f32.xlu1 %v1386_v13 }
 0x18b   : > { %v1632_v7 = vpop.eup %1631 }
 0x18c   : > { %v309_v14 = vmul.f32 %v1632_v7, %v306_v29  ;;  %vm315_vm7 = vweird.f32 %v1632_v7 }
 0x18d   : > { %vm316_vm10 = vmor %vm314_vm6, %vm315_vm7  ;;  %vm806_vm6 = vcmask 1040384   ;;  %vm813_vm7 = vcmask 1044480  }
 0x18e   : > { %v310_v40 = vmul.f32 %v1632_v7, %v309_v14 }
 0x190   : > { %v311_v44 = vmul.f32 0.5, %v310_v40 }
 0x192   : > { %v312_v47 = vsub.f32 1.5, %v311_v44 }
 0x194   : > { %v313_v55 = vmul.f32 %v1632_v7, %v312_v47 }
 0x1df   : > { %v2072_v59 = vpop.xlane.xlu1 %738 }
 0x1e0   : > { %vm740_vm4 = vcmp.eq.f32.partialorder %v737_v1, %v2072_v59  ;;  %v937_v1 = vmul.f32 %v2135_v23, %v2135_v23 }
 0x1e1   : > { %v741_v27 = vsel %vm740_vm4, %v736_v60, inf  ;;  %v940_v60 = vmul.f32 %v2156_v17, %v2156_v17 }
 0x1e2   : > { %742 = vmin.xlane.f32.xlu2 %v741_v27  ;;  %v941_v27 = vmul.f32 %v2159_v58, %v2159_v58 }
 0x1e3   : > { %v944_v9 = vadd.f32 %v943_v62, %v940_v60 }
 0x1e5   : > { %v945_v11 = vrot.slane %v944_v9, 4 }
 0x1e7   : > { %v946_v20 = vadd.f32 %v945_v11, %v944_v9 }
 0x1e9   : > { %v947_v36 = vrot.slane %v946_v20, 2 }
 0x1eb   : > { %v948_v39 = vadd.f32 %v947_v36, %v946_v20 }
 0x1ed   : > { %v949_v43 = vrot.slane %v948_v39, 1 }
 0x1ef   : > { %v950_v46 = vadd.f32 %v949_v43, %v948_v39 }
 0x1f1   : > { %v960_v54 = vmax.f32 %v950_v46, 1e-20 }
 0x1f3   : > { %vm968_vm14 = vweird.f32 %v960_v54 }
 0x1fc   : > { %v2075_v3 = vpop.xlane.xlu1 %1387 }
 0x1fd   : > { %vm1389_vm5 = vcmp.eq.f32.partialorder %v1386_v13, %v2075_v3  ;;  %v951_v13 = vadd.f32 %v937_v1, %v935_v56  ;;  %v2166_v1 = vsel %vm316_vm10, %v1632_v7, %v313_v55 }
 0x1fe   : > { %v1390_v26 = vsel %vm1389_vm5, %v1385_v63, inf  ;;  %v307_v63 = vmax.f32 %v305_v57, 1e-20  ;;  %v745_v57 = vcvt.f32.s32 %v2072_v59  ;;  %v2172_v29 = vmul.f32 %v2166_v1, %v2086_v4 }
 0x1ff   : > { %1391 = vmin.xlane.f32.xlu2 %v1390_v26  ;;  %v952_v26 = vadd.f32 %v951_v13, %v939_v0  ;;  %v2180_v59 = vmul.f32 %v2166_v1, %v2092_v10  ;;  %v2210_v11 = vmul.f32 %v2166_v1, %v2104_v8 }
 0x200   : > { %1633 = vrsqrt.f32 %v307_v63  ;;  %vm324_vm8 = vweird.f32 %v307_v63  ;;  %v746_v61 = vshll.u32 %v745_v57, 16 }
 0x201   : > { %v953_v6 = vadd.f32 %v952_v26, %v941_v27  ;;  %1635 = vrsqrt.f32 %v960_v54 }
 0x203   : > { %v954_v15 = vrot.slane %v953_v6, 4 }
 0x205   : > { %v955_v28 = vadd.f32 %v954_v15, %v953_v6 }
 0x206   : > { %v1634_v34 = vpop.eup %1633 }
 0x207   : > { %v319_v37 = vmul.f32 %v1634_v34, %v307_v63  ;;  %v956_v38 = vrot.slane %v955_v28, 2  ;;  %vm325_vm9 = vweird.f32 %v1634_v34  ;;  %v1636_v63 = vpop.eup %1635 }
 0x208   : > { %vm326_vm11 = vmor %vm324_vm8, %vm325_vm9  ;;  %v963_v20 = vmul.f32 %v1636_v63, %v960_v54  ;;  %vm969_vm15 = vweird.f32 %v1636_v63 }
 0x209   : > { %v320_v41 = vmul.f32 %v1634_v34, %v319_v37  ;;  %v957_v42 = vadd.f32 %v956_v38, %v955_v28  ;;  %vm970_vm2 = vmor %vm968_vm14, %vm969_vm15 }
 0x20a   : > { %v964_v8 = vmul.f32 %v1636_v63, %v963_v20 }
 0x20b   : > { %v321_v45 = vmul.f32 0.5, %v320_v41  ;;  %v958_v50 = vrot.slane %v957_v42, 1 }
 0x20c   : > { %v965_v37 = vmul.f32 0.5, %v964_v8 }
 0x20d   : > { %v322_v48 = vsub.f32 1.5, %v321_v45  ;;  %v959_v49 = vadd.f32 %v958_v50, %v957_v42  ;;  %v1394_v42 = vcvt.f32.s32 %v2075_v3 }
 0x20e   : > { %v966_v38 = vsub.f32 1.5, %v965_v37 }
 0x20f   : > { %v323_v56 = vmul.f32 %v1634_v34, %v322_v48  ;;  %v961_v31 = vmax.f32 %v959_v49, 1e-20  ;;  %v1395_v50 = vshll.u32 %v1394_v42, 16 }
 0x210   : > { %v967_v40 = vmul.f32 %v1636_v63, %v966_v38 }
 0x211   : > { %v2168_v18 = vsel %vm326_vm11, %v1634_v34, %v323_v56  ;;  %1637 = vrsqrt.f32 %v961_v31  ;;  %vm978_vm0 = vweird.f32 %v961_v31 }
 0x212   : > { %v2176_v60 = vmul.f32 %v2168_v18, %v2089_v5  ;;  %v2184_v27 = vmul.f32 %v2168_v18, %v2095_v25  ;;  %v2214_v15 = vmul.f32 %v2168_v18, %v2107_v12  ;;  %v971_v43 = vsel %vm970_vm2, %v1636_v63, %v967_v40 }
 0x213   : > { %v2226_v47 = vmul.f32 %v2156_v17, %v971_v43  ;;  %v984_v49 = vmul.f32 %v2132_v53, %v971_v43  ;;  %v982_v56 = vmul.f32 %v2126_v51, %v971_v43  ;;  %v986_v63 = vmul.f32 %v2144_v2, %v971_v43 }
 0x217   : > { %v1638_v26 = vpop.eup %1637 }
 0x218   : > { %v973_v7 = vmul.f32 %v1638_v26, %v961_v31  ;;  %vm979_vm1 = vweird.f32 %v1638_v26 }
 0x219   : > { %vm980_vm3 = vmor %vm978_vm0, %vm979_vm1 }
 0x21a   : > { %v974_v36 = vmul.f32 %v1638_v26, %v973_v7 }
 0x21c   : > { %v975_v12 = vmul.f32 0.5, %v974_v36 }
 0x21e   : > { %v976_v39 = vsub.f32 1.5, %v975_v12 }
 0x220   : > { %v977_v41 = vmul.f32 %v1638_v26, %v976_v39 }
 0x222   : > { %v981_v44 = vsel %vm980_vm3, %v1638_v26, %v977_v41 }
 0x223   : > { %v2229_v48 = vmul.f32 %v2159_v58, %v981_v44  ;;  %v985_v54 = vmul.f32 %v2135_v23, %v981_v44  ;;  %v983_v3 = vmul.f32 %v2129_v52, %v981_v44  ;;  %v987_v26 = vmul.f32 %v2147_v19, %v981_v44 }
 0x255   : > { %v743_v0 = vpop.xlane.xlu2 %742 }
 0x256   : > { %v744_v13 = vcvt.f32.s32 %v743_v0 }
 0x258   : > { %v2186_v62 = vadd.s32 %v746_v61, %v744_v13  ;;  %v334_v61 = vmul.f32 %v2166_v1, %v2116_v30  ;;  %v335_v13 = vmul.f32 %v2168_v18, %v2119_v32 }
 0x25a   : > { %vm748_vm12 = vcmp.eq.s32.totalorder %v2063_v22, %v2186_v62  ;;  %vm749_vm13 = vcmp.eq.s32.totalorder %v2066_v16, %v2186_v62 }
 0x25b   : > { %v754_v4 = vsel %vm748_vm12, %v2172_v29, 0.0  ;;  %v755_v5 = vsel %vm749_vm13, %v2176_v60, 0.0  ;;  %v756_v10 = vsel %vm748_vm12, %v2180_v59, 0.0  ;;  %v757_v25 = vsel %vm749_vm13, %v2184_v27, 0.0 }
 0x25c   : > { %v762_v9 = vadd.f32 %v755_v5, %v754_v4  ;;  %v765_v6 = vadd.f32 %v757_v25, %v756_v10  ;;  %v758_v28 = vsel %vm748_vm12, %v2210_v11, 0.0  ;;  %v759_v34 = vsel %vm749_vm13, %v2214_v15, 0.0 }
 0x25d   : > { %v768_v14 = vadd.f32 %v759_v34, %v758_v28  ;;  %v760_v4 = vsel %vm748_vm12, %v334_v61, 0.0  ;;  %v761_v5 = vsel %vm749_vm13, %v335_v13, 0.0 }
 0x25e   : > { %763 = vadd.xlane.f32.xlu0 %v762_v9  ;;  %766 = vadd.xlane.f32.xlu1 %v765_v6  ;;  %v771_v1 = vadd.f32 %v761_v5, %v760_v4  ;;  %v802_v4 = vrot.slane %v2047_v33, 7  ;;  %v803_v5 = vrot.slane %v2051_v35, 7 }
 0x266   : > { %769 = vadd.xlane.f32.xlu1 %v768_v14 }
 0x272   : > { %v1392_v45 = vpop.xlane.xlu2 %1391 }
 0x273   : > { %v1393_v46 = vcvt.f32.s32 %v1392_v45 }
 0x275   : > { %v1396_v55 = vadd.s32 %v1395_v50, %v1393_v46 }
 0x277   : > { %vm1397_vm4 = vcmp.eq.s32.totalorder %v2063_v22, %v1396_v55  ;;  %vm1398_vm5 = vcmp.eq.s32.totalorder %v2066_v16, %v1396_v55 }
 0x278   : > { %v1409_v17 = vsel %vm1397_vm4, %v2226_v47, 0.0  ;;  %v1410_v58 = vsel %vm1398_vm5, %v2229_v48, 0.0  ;;  %v1405_v53 = vsel %vm1397_vm4, %v984_v49, 0.0  ;;  %v1406_v51 = vsel %vm1398_vm5, %v985_v54, 0.0 }
 0x279   : > { %v1420_v23 = vadd.f32 %v1410_v58, %v1409_v17  ;;  %v1414_v52 = vadd.f32 %v1406_v51, %v1405_v53  ;;  %v1403_v31 = vsel %vm1397_vm4, %v982_v56, 0.0  ;;  %v1404_v57 = vsel %vm1398_vm5, %v983_v3, 0.0 }
 0x27a   : > { %v1411_v0 = vadd.f32 %v1404_v57, %v1403_v31  ;;  %v1407_v30 = vsel %vm1397_vm4, %v986_v63, 0.0  ;;  %v1408_v32 = vsel %vm1398_vm5, %v987_v26, 0.0 }
 0x27b   : > { %1421 = vadd.xlane.f32.xlu1 %v1420_v23  ;;  %1415 = vadd.xlane.f32.xlu0 %v1414_v52  ;;  %v1417_v18 = vadd.f32 %v1408_v32, %v1407_v30 }
 0x27c   : > { %1412 = vadd.xlane.f32.xlu2 %v1411_v0 }
 0x283   : > { %772 = vadd.xlane.f32.xlu0 %v771_v1 }
 0x284   : > { %1418 = vadd.xlane.f32.xlu2 %v1417_v18 }
 0x2d1   : > { %v767_v2 = vpop.xlane.xlu1 %766  ;;  %v764_v19 = vpop.xlane.xlu0 %763 }
 0x2d2   : > { %v776_v6 = vmul.f32 %v767_v2, %v2180_v59  ;;  %v777_v62 = vmul.f32 %v767_v2, %v2184_v27  ;;  %v774_v20 = vmul.f32 %v764_v19, %v2172_v29  ;;  %v775_v22 = vmul.f32 %v764_v19, %v2176_v60 }
 0x2d3   : > { %v1451_v2 = vrot.slane %v2055_v24, 7  ;;  %v1452_v19 = vrot.slane %v2059_v21, 7 }
 0x2d4   : > { %v782_v14 = vadd.f32 %v776_v6, %v774_v20  ;;  %v791_v37 = vadd.f32 %v777_v62, %v775_v22 }
 0x2d9   : > { %v770_v25 = vpop.xlane.xlu1 %769 }
 0x2da   : > { %v778_v16 = vmul.f32 %v770_v25, %v2210_v11  ;;  %v779_v7 = vmul.f32 %v770_v25, %v2214_v15 }
 0x2dc   : > { %v783_v38 = vadd.f32 %v782_v14, %v778_v16  ;;  %v792_v39 = vadd.f32 %v791_v37, %v779_v7 }
 0x2ee   : > { %v1416_v10 = vpop.xlane.xlu0 %1415  ;;  %v1422_v59 = vpop.xlane.xlu1 %1421 }
 0x2ef   : > { %v1413_v9 = vpop.xlane.xlu2 %1412  ;;  %v1425_v8 = vmul.f32 %v1416_v10, %v984_v49  ;;  %v1426_v36 = vmul.f32 %v1416_v10, %v985_v54  ;;  %v1429_v15 = vmul.f32 %v1422_v59, %v2226_v47  ;;  %v1430_v45 = vmul.f32 %v1422_v59, %v2229_v48 }
 0x2f0   : > { %v1423_v28 = vmul.f32 %v1413_v9, %v982_v56  ;;  %v1424_v34 = vmul.f32 %v1413_v9, %v983_v3 }
 0x2f2   : > { %v1431_v29 = vadd.f32 %v1425_v8, %v1423_v28  ;;  %v1440_v42 = vadd.f32 %v1426_v36, %v1424_v34 }
 0x2f6   : > { %v773_v12 = vpop.xlane.xlu0 %772 }
 0x2f7   : > { %v1419_v40 = vpop.xlane.xlu2 %1418  ;;  %v780_v27 = vmul.f32 %v773_v12, %v334_v61  ;;  %v781_v41 = vmul.f32 %v773_v12, %v335_v13 }
 0x2f8   : > { %v1427_v60 = vmul.f32 %v1419_v40, %v986_v63  ;;  %v1428_v43 = vmul.f32 %v1419_v40, %v987_v26 }
 0x2f9   : > { %v784_v11 = vadd.f32 %v783_v38, %v780_v27  ;;  %v793_v44 = vadd.f32 %v792_v39, %v781_v41 }
 0x2fa   : > { %v1432_v50 = vadd.f32 %v1431_v29, %v1427_v60  ;;  %v1441_v46 = vadd.f32 %v1440_v42, %v1428_v43 }
 0x2fb   : > { %v785_v49 = vrot.slane %v784_v11, 4  ;;  %v794_v54 = vrot.slane %v793_v44, 4 }
 0x2fc   : > { %v1433_v55 = vadd.f32 %v1432_v50, %v1429_v15  ;;  %v1442_v56 = vadd.f32 %v1441_v46, %v1430_v45 }
 0x2fd   : > { %v786_v3 = vadd.f32 %v785_v49, %v784_v11  ;;  %v795_v17 = vadd.f32 %v794_v54, %v793_v44 }
 0x2fe   : > { %v1434_v58 = vrot.slane %v1433_v55, 4  ;;  %v1443_v53 = vrot.slane %v1442_v56, 4 }
 0x2ff   : > { %v787_v51 = vrot.slane %v786_v3, 2  ;;  %v796_v23 = vrot.slane %v795_v17, 2 }
 0x300   : > { %v1435_v52 = vadd.f32 %v1434_v58, %v1433_v55  ;;  %v1444_v31 = vadd.f32 %v1443_v53, %v1442_v56 }
 0x301   : > { %v788_v57 = vadd.f32 %v787_v51, %v786_v3  ;;  %v797_v0 = vadd.f32 %v796_v23, %v795_v17 }
 0x302   : > { %v1436_v61 = vrot.slane %v1435_v52, 2  ;;  %v1445_v47 = vrot.slane %v1444_v31, 2 }
 0x303   : > { %v789_v13 = vrot.slane %v788_v57, 1  ;;  %v798_v48 = vrot.slane %v797_v0, 1 }
 0x304   : > { %v1437_v63 = vadd.f32 %v1436_v61, %v1435_v52  ;;  %v1446_v26 = vadd.f32 %v1445_v47, %v1444_v31 }
 0x305   : > { %v790_v30 = vadd.f32 %v789_v13, %v788_v57  ;;  %v799_v32 = vadd.f32 %v798_v48, %v797_v0 }
 0x306   : > { %v1438_v1 = vrot.slane %v1437_v63, 1  ;;  %v1447_v18 = vrot.slane %v1446_v26, 1 }
 0x307   : > { %v807_v10 = vsel %vm806_vm6, %v790_v30, %v802_v4  ;;  %v808_v25 = vsel %vm806_vm6, %v799_v32, %v803_v5 }
 0x308   : > { %v1439_v9 = vadd.f32 %v1438_v1, %v1437_v63  ;;  %v1448_v6 = vadd.f32 %v1447_v18, %v1446_v26  ;;  %v809_v62 = vmul.f32 1.442695, %v807_v10  ;;  %v811_v20 = vmul.f32 1.442695, %v808_v25 }
 0x30a   : > { %v1455_v33 = vsel %vm806_vm6, %v1439_v9, %v1451_v2  ;;  %v1456_v35 = vsel %vm806_vm6, %v1448_v6, %v1452_v19  ;;  %1639 = vpow2.f32 %v809_v62 }
 0x30b   : > { %v1457_v22 = vmul.f32 1.442695, %v1455_v33  ;;  %v1459_v16 = vmul.f32 1.442695, %v1456_v35  ;;  %1641 = vpow2.f32 %v811_v20 }
 0x30d   : > { %1643 = vpow2.f32 %v1457_v22 }
 0x30e   : > { %1645 = vpow2.f32 %v1459_v16 }
 0x310   : > { %v2283_v24 = vpop.eup %1639 }
 0x311   : > { %v2285_v21 = vpop.eup %1641  ;;  %v814_v7 = vsel %vm813_vm7, %v2283_v24, 0.0 }
 0x312   : > { %v815_v28 = vrot.slane %v814_v7, 4  ;;  %v821_v34 = vsel %vm813_vm7, %v2285_v21, 0.0 }
 0x313   : > { %v2289_v8 = vpop.eup %1643  ;;  %v822_v36 = vrot.slane %v821_v34, 4 }
 0x314   : > { %v2291_v14 = vpop.eup %1645  ;;  %v1461_v37 = vsel %vm813_vm7, %v2289_v8, 0.0  ;;  %v816_v12 = vadd.f32 %v815_v28, %v814_v7 }
 0x315   : > { %v1462_v38 = vrot.slane %v1461_v37, 4  ;;  %v1468_v39 = vsel %vm813_vm7, %v2291_v14, 0.0  ;;  %v823_v59 = vadd.f32 %v822_v36, %v821_v34 }
 0x316   : > { %v1469_v40 = vrot.slane %v1468_v39, 4  ;;  %v817_v27 = vrot.slane %v816_v12, 2 }
 0x317   : > { %v1463_v41 = vadd.f32 %v1462_v38, %v1461_v37  ;;  %v824_v29 = vrot.slane %v823_v59, 2 }
 0x318   : > { %v1470_v42 = vadd.f32 %v1469_v40, %v1468_v39  ;;  %v818_v60 = vadd.f32 %v817_v27, %v816_v12 }
 0x319   : > { %v1464_v43 = vrot.slane %v1463_v41, 2  ;;  %v825_v11 = vadd.f32 %v824_v29, %v823_v59 }
 0x31a   : > { %v1471_v44 = vrot.slane %v1470_v42, 2  ;;  %v819_v15 = vrot.slane %v818_v60, 1 }
 0x31b   : > { %v1465_v45 = vadd.f32 %v1464_v43, %v1463_v41  ;;  %v826_v50 = vrot.slane %v825_v11, 1 }
 0x31c   : > { %v1472_v46 = vadd.f32 %v1471_v44, %v1470_v42  ;;  %v820_v49 = vadd.f32 %v819_v15, %v818_v60 }
 0x31d   : > { %v1466_v54 = vrot.slane %v1465_v45, 1  ;;  %v827_v55 = vadd.f32 %v826_v50, %v825_v11 }
 0x31e   : > { %v1473_v56 = vrot.slane %v1472_v46, 1  ;;  %1647 = vrcp.f32 %v820_v49  ;;  %v837_v58 = vand.u32 2147483647, %v820_v49  ;;  %vm833_vm8 = vweird.f32 %v820_v49 }
 0x31f   : > { %v1467_v3 = vadd.f32 %v1466_v54, %v1465_v45  ;;  %1649 = vrcp.f32 %v827_v55  ;;  %v839_v52 = vand.u32 2147483648, %v820_v49  ;;  %vm847_vm9 = vweird.f32 %v827_v55 }
 0x320   : > { %v1474_v17 = vadd.f32 %v1473_v56, %v1472_v46  ;;  %vm2295_vm10 = vcmp.eq.f32.partialorder %v837_v58, 8.507059e+37  ;;  %v851_v47 = vand.u32 2147483647, %v827_v55  ;;  %v853_v13 = vand.u32 2147483648, %v827_v55 }
 0x321   : > { %1651 = vrcp.f32 %v1467_v3  ;;  %vm1480_vm11 = vweird.f32 %v1467_v3  ;;  %v1484_v26 = vand.u32 2147483647, %v1467_v3  ;;  %v1486_v5 = vand.u32 2147483648, %v1467_v3 }
 0x322   : > { %1653 = vrcp.f32 %v1474_v17  ;;  %vm1494_vm13 = vweird.f32 %v1474_v17  ;;  %v1498_v19 = vand.u32 2147483647, %v1474_v17  ;;  %v1500_v10 = vand.u32 2147483648, %v1474_v17 }
 0x323   : > { %v840_v6 = vor.u32 1.1754944e-38, %v839_v52  ;;  %v854_v35 = vor.u32 1.1754944e-38, %v853_v13  ;;  %vm852_vm3 = vcmp.eq.f32.partialorder %v851_v47, 8.507059e+37  ;;  %v1487_v28 = vor.u32 1.1754944e-38, %v1486_v5 }
 0x324   : > { %v1648_v53 = vpop.eup %1647  ;;  %vm1485_vm5 = vcmp.eq.f32.partialorder %v1484_v26, 8.507059e+37  ;;  %v1501_v38 = vor.u32 1.1754944e-38, %v1500_v10  ;;  %vm1499_vm7 = vcmp.eq.f32.partialorder %v1498_v19, 8.507059e+37 }
 0x325   : > { %v1650_v51 = vpop.eup %1649  ;;  %v829_v23 = vmul.f32 %v1648_v53, %v820_v49  ;;  %vm834_vm12 = vweird.f32 %v1648_v53 }
 0x326   : > { %v843_v31 = vmul.f32 %v1650_v51, %v827_v55  ;;  %vm848_vm14 = vweird.f32 %v1650_v51  ;;  %vm835_vm0 = vmor %vm833_vm8, %vm834_vm12 }
 0x327   : > { %v1652_v57 = vpop.eup %1651  ;;  %v830_v0 = vsub.f32 1.0, %v829_v23  ;;  %vm849_vm2 = vmor %vm847_vm9, %vm848_vm14 }
 0x328   : > { %v1654_v48 = vpop.eup %1653  ;;  %v1476_v63 = vmul.f32 %v1652_v57, %v1467_v3  ;;  %v844_v4 = vsub.f32 1.0, %v843_v31  ;;  %vm1481_vm15 = vweird.f32 %v1652_v57 }
 0x329   : > { %v1490_v30 = vmul.f32 %v1654_v48, %v1474_v17  ;;  %v831_v32 = vmul.f32 %v1648_v53, %v830_v0  ;;  %vm1495_vm1 = vweird.f32 %v1654_v48  ;;  %vm1482_vm4 = vmor %vm1480_vm11, %vm1481_vm15 }
 0x32a   : > { %v1477_v1 = vsub.f32 1.0, %v1476_v63  ;;  %v845_v18 = vmul.f32 %v1650_v51, %v844_v4  ;;  %vm1496_vm6 = vmor %vm1494_vm13, %vm1495_vm1 }
 0x32b   : > { %v1491_v2 = vsub.f32 1.0, %v1490_v30  ;;  %v832_v25 = vadd.f32 %v1648_v53, %v831_v32 }
 0x32c   : > { %v1478_v9 = vmul.f32 %v1652_v57, %v1477_v1  ;;  %v846_v62 = vadd.f32 %v1650_v51, %v845_v18 }
 0x32d   : > { %v1492_v20 = vmul.f32 %v1654_v48, %v1491_v2  ;;  %v836_v33 = vsel %vm835_vm0, %v1648_v53, %v832_v25 }
 0x32e   : > { %v1479_v22 = vadd.f32 %v1652_v57, %v1478_v9  ;;  %v841_v16 = vsel %vm2295_vm10, %v840_v6, %v836_v33  ;;  %v850_v7 = vsel %vm849_vm2, %v1650_v51, %v846_v62 }
 0x32f   : > { %v1493_v34 = vadd.f32 %v1654_v48, %v1492_v20  ;;  %v855_v36 = vsel %vm852_vm3, %v854_v35, %v850_v7  ;;  %v856_v37 = vmul.f32 %v2283_v24, %v841_v16 }
 0x330   : > { %v1483_v12 = vsel %vm1482_vm4, %v1652_v57, %v1479_v22  ;;  %v857_v39 = vmul.f32 %v2285_v21, %v855_v36 }
 0x331   : > { %v1488_v59 = vsel %vm1485_vm5, %v1487_v28, %v1483_v12  ;;  %v1497_v40 = vsel %vm1496_vm6, %v1654_v48, %v1493_v34  ;;  %858 = vst [vmem:[%s202_s27] sm:$0x1f] %v856_v37 }
 0x332   : > { %v1502_v27 = vsel %vm1499_vm7, %v1501_v38, %v1497_v40  ;;  %v1503_v41 = vmul.f32 %v2289_v8, %v1488_v59  ;;  %859 = vst [vmem:[%s202_s27 + $0x8] sm:$0x1f] %v857_v39 }
 0x333   : > { %v1504_v29 = vmul.f32 %v2291_v14, %v1502_v27 }
 0x334   : > { %1608 = vst [vmem:[%s202_s27 + $0x10] sm:$0x1f] %v1503_v41 }
 0x335   : > { %1609 = vst [vmem:[%s202_s27 + $0x18] sm:$0x1f] %v1504_v29 }
 0x336 PF: > { %s13_s12 = sadd.s32 1, %s1661_s12  }
 0x337   : > { %p10_p4 = scmp.ge.s32.totalorder %s13_s12, 4  }
 0x339   :  { %12 = sbr.rel (!%p10_p4) target bundleno = 1 (0x1), region = 68 }

</bundles_post_ra>
